<compile_context>
chip_gen: v5e
topology: v5e:2x2
jax: 0.10.0
libtpu: 0.0.40
codegen_flags: <defaults>
</compile_context>

<pallas_src>
import numpy as np
import jax
import jax.numpy as jnp
from jax.experimental import pallas as pl
from jax.experimental.pallas import tpu as pltpu

N_QUBITS = 4
N_LAYERS = 2
DIM = 2 ** N_QUBITS          # 16 amplitudes per row
QHID = 32                    # quantum_hidden_dim
BATCH = 8
BN_EPS = 1e-5

LANES = 128                  # TPU vreg lane width
PACK = LANES // DIM          # 8 batch rows packed per 128-lane row


def _round_up(v, m):
    return ((v + m - 1) // m) * m


# ----------------------------------------------------------------------------
# Circuit construction (plain numpy glue — parameter setup, not the hot path)
# ----------------------------------------------------------------------------
_I2 = np.eye(2, dtype=np.complex128)
_H = (1.0 / np.sqrt(2.0)) * np.array([[1, 1], [1, -1]], dtype=np.complex128)
_S = np.array([[1, 0], [0, 1j]], dtype=np.complex128)
_X = np.array([[0, 1], [1, 0]], dtype=np.complex128)
_Z = np.array([[1, 0], [0, -1]], dtype=np.complex128)


def _ry(t):
    c, s = np.cos(t / 2), np.sin(t / 2)
    return np.array([[c, -s], [s, c]], dtype=np.complex128)


def _rz(t):
    return np.array([[np.exp(-1j * t / 2), 0], [0, np.exp(1j * t / 2)]],
                    dtype=np.complex128)


def _rx(t):
    c, s = np.cos(t / 2), np.sin(t / 2)
    return np.array([[c, -1j * s], [-1j * s, c]], dtype=np.complex128)


def _kron_all(ops):
    u = ops[0]
    for o in ops[1:]:
        u = np.kron(u, o)
    return u


def _single(gate, wire):
    ops = [_I2] * N_QUBITS
    ops[wire] = gate
    return _kron_all(ops)


def _controlled(gate, control, target):
    p0 = np.array([[1, 0], [0, 0]], dtype=np.complex128)
    p1 = np.array([[0, 0], [0, 1]], dtype=np.complex128)
    ops0 = [_I2] * N_QUBITS
    ops0[control] = p0
    ops1 = [_I2] * N_QUBITS
    ops1[control] = p1
    ops1[target] = gate
    return _kron_all(ops0) + _kron_all(ops1)


def circuit_unitary(params):
    """Full unitary of quantum_circuit for one (n_layers, 3*n_qubits) param set.
    PennyLane wire-0-is-MSB convention."""
    u = np.eye(DIM, dtype=np.complex128)
    for layer in range(N_LAYERS):
        for i in range(N_QUBITS):
            u = _single(_H, i) @ u
        for i in range(N_QUBITS):
            u = _single(_ry(params[layer, i]), i) @ u
            u = _single(_rz(params[layer, i + N_QUBITS]), i) @ u
            u = _single(_rx(params[layer, i + 2 * N_QUBITS]), i) @ u
        for i in range(N_QUBITS):
            u = _single(_S, i) @ u
        for i in range(N_QUBITS - 1):
            u = _controlled(_X, i, i + 1) @ u
            u = _controlled(_Z, i, i + 1) @ u
        u = _controlled(_X, N_QUBITS - 1, 0) @ u
        u = _controlled(_Z, N_QUBITS - 1, 0) @ u
    return u


def z_sign_matrix():
    """(DIM, N_QUBITS): <Z_i> = probs @ signs.  Wire 0 is the most-significant bit."""
    k = np.arange(DIM)
    signs = np.zeros((DIM, N_QUBITS), dtype=np.float32)
    for i in range(N_QUBITS):
        bit = (k >> (N_QUBITS - 1 - i)) & 1
        signs[:, i] = 1.0 - 2.0 * bit.astype(np.float32)
    return signs


def fold_constants(u_list, zs, w, b, gamma, beta, rmean, rvar):
    """Host-side algebraic fusion.

    Returns:
      u_cat : (16, 96)  = [U1^T.re | U2^T.re | U3^T.re | U1^T.im | U2^T.im | U3^T.im]
      p_eff : (96, 32)  = vstack(W_eff, W_eff) with W_eff = (zblk @ w) * bn_scale
      b_eff : (1, 32)   = b * bn_scale + bn_shift
    """
    ure_cat = np.concatenate([u.T.real for u in u_list], axis=1)           # (16, 48)
    uim_cat = np.concatenate([u.T.imag for u in u_list], axis=1)           # (16, 48)
    u_cat = np.concatenate([ure_cat, uim_cat], axis=1).astype(np.float64)  # (16, 96)

    zblk = np.zeros((3 * DIM, 3 * N_QUBITS), dtype=np.float64)             # (48, 12)
    for c in range(3):
        zblk[c * DIM:(c + 1) * DIM, c * N_QUBITS:(c + 1) * N_QUBITS] = zs

    bn_scale = gamma / np.sqrt(rvar + BN_EPS)                              # (32,)
    bn_shift = beta - rmean * bn_scale                                     # (32,)

    w_eff = (zblk @ np.asarray(w, np.float64)) * bn_scale[None, :]         # (48, 32)
    p_eff = np.concatenate([w_eff, w_eff], axis=0)                         # (96, 32)
    b_eff = (np.asarray(b, np.float64) * bn_scale + bn_shift)
    return u_cat, p_eff, b_eff.reshape(1, QHID)


def pack_constants(u_cat, p_eff, b_eff):
    """Block-diagonalize the folded constants so 8 batch rows share one 128-lane row."""
    eye = np.eye(PACK, dtype=np.float64)
    g_blk = np.kron(eye, np.ones((DIM, DIM), np.float64)).astype(np.float32)   # (128, 128)
    u_blk = np.kron(eye, np.asarray(u_cat, np.float64)).astype(np.float32)     # (128, 768)
    p_blk = np.kron(eye, np.asarray(p_eff, np.float64)).astype(np.float32)     # (768, 256)
    b_blk = np.tile(np.asarray(b_eff, np.float32), (1, PACK))                  # (1, 256)
    return g_blk, u_blk, p_blk, b_blk


# ----------------------------------------------------------------------------
# Pallas kernel: fused forward hot path on packed 128-lane rows (3 MXU pushes/tile)
# ----------------------------------------------------------------------------
def _qfe_kernel(xp_ref, g_ref, u_ref, p_ref, b_ref, o_ref):
    xp = xp_ref[...]                                             # (tbp, 128)
    # Per 16-lane group (= per original batch row) L2 norm, expanded back to 128 lanes
    # with one MXU push; rsqrt goes to the EUP slot.  Clamp keeps zero / garbage
    # edge-block rows finite (their writes are masked off anyway).
    nrm2 = jnp.dot(xp * xp, g_ref[...], preferred_element_type=jnp.float32)
    xn = xp * jax.lax.rsqrt(jnp.maximum(nrm2, 1e-30))            # AmplitudeEmbedding(normalize=True)
    # re/im amplitudes of all 3 circuits for 8 packed rows: (tbp, 768)
    s = jnp.dot(xn, u_ref[...], preferred_element_type=jnp.float32)
    # |.|^2 -> PauliZ projection -> fc -> BN(eval) folded to one affine, then ReLU.
    feat = jnp.dot(s * s, p_ref[...], preferred_element_type=jnp.float32) + b_ref[...]
    o_ref[...] = jnp.maximum(feat, 0.0)                          # dropout = identity in eval mode


def quantum_feature_extractor(x, g_blk, u_blk, p_blk, b_blk, *, tile_rows=8192):
    """x: (batch, 16) f32  ->  (batch, 32) f32."""
    bsz = x.shape[0]
    b_pad = _round_up(max(bsz, 1), PACK)
    if b_pad != bsz:
        # Tiny pad (< 8 rows) so the packed reshape is exact; zero rows are harmless
        # (rsqrt clamp) and sliced off below.
        x = jnp.pad(x, ((0, b_pad - bsz), (0, 0)))
    n_pack = b_pad // PACK
    xp = x.reshape(n_pack, LANES)            # free: contiguous row-major view

    # Packed-row tile: large (default 8192 batch rows = 1024 packed rows) to amortize
    # per-grid-step overhead; multiple of 8 sublanes unless it is the full extent;
    # capped so large batches get >= 2 grid steps (v7x megacore sharding).
    tile_pack = max(1, tile_rows // PACK)
    if n_pack <= 8:
        tbp = n_pack
    else:
        tbp = max(8, (min(tile_pack, n_pack) // 8) * 8)
        if n_pack >= 16 and pl.cdiv(n_pack, tbp) < 2:
            tbp = max(8, _round_up(pl.cdiv(n_pack, 2), 8))
    grid = (pl.cdiv(n_pack, tbp),)           # partial edge block: masked writes, no big pad

    hid_l = PACK * QHID                      # 256 lane-dense output columns
    out_pack = pl.pallas_call(
        _qfe_kernel,
        out_shape=jax.ShapeDtypeStruct((n_pack, hid_l), jnp.float32),
        grid=grid,
        in_specs=[
            pl.BlockSpec((tbp, LANES), lambda i: (i, 0)),              # x tile, pipelined
            pl.BlockSpec((LANES, LANES), lambda i: (0, 0)),            # G_blk, resident
            pl.BlockSpec((LANES, PACK * 6 * DIM), lambda i: (0, 0)),   # U_blk, resident
            pl.BlockSpec((PACK * 6 * DIM, hid_l), lambda i: (0, 0)),   # P_blk, resident
            pl.BlockSpec((1, hid_l), lambda i: (0, 0)),                # b_blk, resident
        ],
        out_specs=pl.BlockSpec((tbp, hid_l), lambda i: (i, 0)),
        compiler_params=pltpu.CompilerParams(
            dimension_semantics=("parallel",),          # batch grid megacore-shardable on v7x
            vmem_limit_bytes=48 * 1024 * 1024),         # explicit; safe on v5e/v6e/v7x
    )(xp, g_blk, u_blk, p_blk, b_blk)

    out = out_pack.reshape(b_pad, QHID)      # free: (B/8, 256) row-major == (B, 32)
    return out[:bsz] if b_pad != bsz else out


# ----------------------------------------------------------------------------
# Pure-numpy reference (f64) for correctness check
# ----------------------------------------------------------------------------
def reference(x, u_list, zs, w, b, gamma, beta, rm, rv):
    x = np.asarray(x, dtype=np.float64)
    xn = x / np.linalg.norm(x, axis=1, keepdims=True)
    outs = []
    for u in u_list:
        state = xn.astype(np.complex128) @ u.T
        probs = np.abs(state) ** 2
        outs.append(probs @ zs.astype(np.float64))
    q_out = np.concatenate(outs, axis=1)
    feat = q_out @ np.asarray(w, np.float64) + np.asarray(b, np.float64)
    feat = (feat - rm) / np.sqrt(rv + BN_EPS) * gamma + beta
    return np.maximum(feat, 0.0)


# ----------------------------------------------------------------------------
if __name__ == "__main__":
    key = jax.random.PRNGKey(0)
    (kx, kp1, kp2, kp3, kw, kb, kg, kbe, krm, krv, kx2, kx3) = jax.random.split(key, 12)

    # quantum weights (TorchLayer weight_shapes: (n_layers, 3*n_qubits)), uniform [0, 2pi)
    p1 = np.array(jax.random.uniform(kp1, (N_LAYERS, 3 * N_QUBITS),
                                     minval=0.0, maxval=2 * np.pi), dtype=np.float64)
    p2 = np.array(jax.random.uniform(kp2, (N_LAYERS, 3 * N_QUBITS),
                                     minval=0.0, maxval=2 * np.pi), dtype=np.float64)
    p3 = np.array(jax.random.uniform(kp3, (N_LAYERS, 3 * N_QUBITS),
                                     minval=0.0, maxval=2 * np.pi), dtype=np.float64)

    u_list = [circuit_unitary(p1), circuit_unitary(p2), circuit_unitary(p3)]
    zs = z_sign_matrix()                                          # (16, 4)

    # fc: Linear(3*n_qubits -> quantum_hidden_dim)
    fan_in = 3 * N_QUBITS
    bound = 1.0 / np.sqrt(fan_in)
    w = np.array(jax.random.uniform(kw, (fan_in, QHID), minval=-bound, maxval=bound),
                 dtype=np.float32)
    b = np.array(jax.random.uniform(kb, (QHID,), minval=-bound, maxval=bound),
                 dtype=np.float32)

    # BatchNorm1d parameters / running stats (eval mode)
    gamma = 1.0 + 0.1 * np.array(jax.random.normal(kg, (QHID,)), dtype=np.float32)
    beta = 0.1 * np.array(jax.random.normal(kbe, (QHID,)), dtype=np.float32)
    rmean = 0.1 * np.array(jax.random.normal(krm, (QHID,)), dtype=np.float32)
    rvar = 1.0 + 0.1 * np.abs(np.array(jax.random.normal(krv, (QHID,)), dtype=np.float32))

    # Host-side algebraic fusion + packed-lane block-diagonalization.
    u_cat, p_eff, b_eff = fold_constants(u_list, zs, w, b, gamma, beta, rmean, rvar)
    g_blk, u_blk, p_blk, b_blk = (jnp.asarray(a) for a in
                                  pack_constants(u_cat, p_eff, b_eff))

    # Validate: module batch (8), a non-multiple-of-8 batch (pad path), and a
    # multi-block grid with a partial edge block (200 -> 25 packed rows, tile 24).
    for kk, bsz in ((kx, BATCH), (kx2, 13), (kx3, 200)):
        x = jax.random.normal(kk, (bsz, DIM), dtype=jnp.float32)
        out = jax.block_until_ready(
            quantum_feature_extractor(x, g_blk, u_blk, p_blk, b_blk))
        ref = reference(np.asarray(x), u_list, zs, w, b, gamma, beta, rmean, rvar)
        np.testing.assert_allclose(np.asarray(out), ref, rtol=5e-3, atol=5e-3)

    print("KERNEL_OK")
</pallas_src>

<mosaic_0001>
module attributes {stable_mosaic.version = 11 : i64} {
  func.func @_qfe_kernel(%arg0: i32, %arg1: memref<1x128xf32, #tpu.memory_space<vmem>>, %arg2: memref<128x128xf32, #tpu.memory_space<vmem>>, %arg3: memref<128x768xf32, #tpu.memory_space<vmem>>, %arg4: memref<768x256xf32, #tpu.memory_space<vmem>>, %arg5: memref<1x256xf32, #tpu.memory_space<vmem>>, %arg6: memref<1x256xf32, #tpu.memory_space<vmem>>) attributes {dimension_semantics = [#tpu.dimension_semantics<parallel>], iteration_bounds = array<i64: 1>, scalar_prefetch = 0 : i64, scratch_operands = 0 : i64, tpu.core_type = #tpu.core_type<tc>, window_params = [{transform_indices = @transform_0, window_bounds = array<i64: 1, 128>}, {pipeline_mode = #tpu.pipeline_mode<synchronous>, transform_indices = @transform_1, window_bounds = array<i64: 128, 128>}, {pipeline_mode = #tpu.pipeline_mode<synchronous>, transform_indices = @transform_2, window_bounds = array<i64: 128, 768>}, {pipeline_mode = #tpu.pipeline_mode<synchronous>, transform_indices = @transform_3, window_bounds = array<i64: 768, 256>}, {pipeline_mode = #tpu.pipeline_mode<synchronous>, transform_indices = @transform_4, window_bounds = array<i64: 1, 256>}, {transform_indices = @transform_5, window_bounds = array<i64: 1, 256>}]} {
    %c0 = arith.constant 0 : index
    %c0_0 = arith.constant 0 : index
    %0 = vector.load %arg1[%c0, %c0_0] : memref<1x128xf32, #tpu.memory_space<vmem>>, vector<1x128xf32>
    %1 = arith.mulf %0, %0 : vector<1x128xf32>
    %c0_1 = arith.constant 0 : index
    %c0_2 = arith.constant 0 : index
    %2 = vector.load %arg2[%c0_1, %c0_2] : memref<128x128xf32, #tpu.memory_space<vmem>>, vector<128x128xf32>
    %cst = arith.constant dense<0.000000e+00> : vector<1x128xf32>
    %3 = tpu.matmul %1, %2, %cst {dimension_numbers = #tpu.dot_dimension_numbers<[1], [0], [0], [1], [0, 0, 1, 1], [], []>} : vector<1x128xf32>, vector<128x128xf32>, vector<1x128xf32> -> vector<1x128xf32>
    %cst_3 = arith.constant 1.000000e-30 : f32
    %4 = vector.broadcast %cst_3 : f32 to vector<1x128xf32>
    %5 = arith.maximumf %3, %4 : vector<1x128xf32>
    %6 = math.rsqrt %5 : vector<1x128xf32>
    %7 = arith.mulf %0, %6 : vector<1x128xf32>
    %c0_4 = arith.constant 0 : index
    %c0_5 = arith.constant 0 : index
    %8 = vector.load %arg3[%c0_4, %c0_5] : memref<128x768xf32, #tpu.memory_space<vmem>>, vector<128x768xf32>
    %cst_6 = arith.constant dense<0.000000e+00> : vector<1x768xf32>
    %9 = tpu.matmul %7, %8, %cst_6 {dimension_numbers = #tpu.dot_dimension_numbers<[1], [0], [0], [1], [0, 0, 1, 1], [], []>} : vector<1x128xf32>, vector<128x768xf32>, vector<1x768xf32> -> vector<1x768xf32>
    %10 = arith.mulf %9, %9 : vector<1x768xf32>
    %c0_7 = arith.constant 0 : index
    %c0_8 = arith.constant 0 : index
    %11 = vector.load %arg4[%c0_7, %c0_8] : memref<768x256xf32, #tpu.memory_space<vmem>>, vector<768x256xf32>
    %cst_9 = arith.constant dense<0.000000e+00> : vector<1x256xf32>
    %12 = tpu.matmul %10, %11, %cst_9 {dimension_numbers = #tpu.dot_dimension_numbers<[1], [0], [0], [1], [0, 0, 1, 1], [], []>} : vector<1x768xf32>, vector<768x256xf32>, vector<1x256xf32> -> vector<1x256xf32>
    %c0_10 = arith.constant 0 : index
    %c0_11 = arith.constant 0 : index
    %13 = vector.load %arg5[%c0_10, %c0_11] : memref<1x256xf32, #tpu.memory_space<vmem>>, vector<1x256xf32>
    %14 = arith.addf %12, %13 : vector<1x256xf32>
    %cst_12 = arith.constant 0.000000e+00 : f32
    %15 = vector.broadcast %cst_12 : f32 to vector<1x256xf32>
    %16 = arith.maximumf %14, %15 : vector<1x256xf32>
    %c0_13 = arith.constant 0 : index
    %c0_14 = arith.constant 0 : index
    %17 = vector.load %arg6[%c0_13, %c0_14] : memref<1x256xf32, #tpu.memory_space<vmem>>, vector<1x256xf32>
    tpu.vector_store %arg6[%c0_13, %c0_14], %16 {strides = array<i32>} : memref<1x256xf32, #tpu.memory_space<vmem>>, vector<1x256xf32>,
    return
  }
  func.func @transform_0(%arg0: i32) -> (i32, i32) {
    %c0_i32 = arith.constant 0 : i32
    %c0_i32_0 = arith.constant 0 : i32
    return %arg0, %c0_i32 : i32, i32
  }
  func.func @transform_1(%arg0: i32) -> (i32, i32) {
    %c0_i32 = arith.constant 0 : i32
    %c0_i32_0 = arith.constant 0 : i32
    %c0_i32_1 = arith.constant 0 : i32
    return %c0_i32, %c0_i32_0 : i32, i32
  }
  func.func @transform_2(%arg0: i32) -> (i32, i32) {
    %c0_i32 = arith.constant 0 : i32
    %c0_i32_0 = arith.constant 0 : i32
    %c0_i32_1 = arith.constant 0 : i32
    return %c0_i32, %c0_i32_0 : i32, i32
  }
  func.func @transform_3(%arg0: i32) -> (i32, i32) {
    %c0_i32 = arith.constant 0 : i32
    %c0_i32_0 = arith.constant 0 : i32
    %c0_i32_1 = arith.constant 0 : i32
    return %c0_i32, %c0_i32_0 : i32, i32
  }
  func.func @transform_4(%arg0: i32) -> (i32, i32) {
    %c0_i32 = arith.constant 0 : i32
    %c0_i32_0 = arith.constant 0 : i32
    %c0_i32_1 = arith.constant 0 : i32
    return %c0_i32, %c0_i32_0 : i32, i32
  }
  func.func @transform_5(%arg0: i32) -> (i32, i32) {
    %c0_i32 = arith.constant 0 : i32
    %c0_i32_0 = arith.constant 0 : i32
    return %arg0, %c0_i32 : i32, i32
  }
}

</mosaic_0001>

<bundles_post_ra>
// kernel: tpu_custom_call.1
= control target key start
LH: loop header
LB: loop body
LE: loop exit
PB: predicated region body
PF: predicated region fallthrough
CT: control target
= control target key end

     0   :  { %10 = vsyncpa [#allocation3], 0  ;;  %s1049_s0 = inlined_call_operand.hbm [shape: f32[1,128], index: 0, kind: input, shape index: {}]   ;;  %s1050_s1 = inlined_call_operand.hbm [shape: f32[128,128], index: 1, kind: input, shape index: {}]   ;;  %s1051_s2 = inlined_call_operand.hbm [shape: f32[128,768], index: 2, kind: input, shape index: {}]   ;;  %s1052_s3 = inlined_call_operand.hbm [shape: f32[768,256], index: 3, kind: input, shape index: {}]   ;;  %s1053_s4 = inlined_call_operand.vmem [shape: f32[1,256], index: 4, kind: input, shape index: {}]   ;;  %s1054_s5 = inlined_call_operand.hbm [shape: f32[1,256], index: 5, kind: output, shape index: {}]  }
   0x1   :  { %11 = vsyncpa [#allocation6], 0 }
   0x2   :  { %12 = vsyncpa [#allocation9], 0  ;;  %s29_s20 = sshll.u32 %s1050_s1, 4  ;;  %s30_s20 = int_to_ptr.hbm [resolvable:$true] %s29_s20 }
   0x3   :  { %13 = vsyncpa [#allocation4], 0  ;;  %s965_s21 = smov [#allocation5]   ;;  %s19_s25 = sshll.u32 %s1049_s0, 4  ;;  %s20_s25 = int_to_ptr.hbm [resolvable:$true] %s19_s25 }
   0x4   :  { %s31_s22 = sshll.u32 %s965_s21, 4  ;;  %s966_s26 = smov 128   ;;  %s32_s22 = int_to_ptr.vmem [resolvable:$true] %s31_s22 }
   0x5   :  { %s967_s27 = smov 8   ;;  %s968_s28 = smov [#allocation2]  }
   0x6   :  { %37 = dma.hbm_to_vmem [thread:$0]  %s30_s20, 2048, %s32_s22, [#allocation6], %s966_s26, %s966_s26, %s967_s27  }
   0x7   :  { %s21_s29 = sshll.u32 %s968_s28, 4  ;;  %s42_s7 = sshll.u32 %s1051_s2, 4  ;;  %s22_s29 = int_to_ptr.vmem [resolvable:$true] %s21_s29  ;;  %s43_s7 = int_to_ptr.hbm [resolvable:$true] %s42_s7 }
   0x8   :  { %24 = dma.hbm_to_vmem [thread:$0]  %s20_s25, 16, %s22_s29, [#allocation3]  }
   0x9   :  { %s969_s1 = smov [#allocation7]   ;;  %s55_s0 = sshll.u32 %s1052_s3, 4  ;;  %s56_s0 = int_to_ptr.hbm [resolvable:$true] %s55_s0 }
   0xa   :  { %s44_s8 = sshll.u32 %s969_s1, 4  ;;  %s970_s11 = smov 768   ;;  %s45_s8 = int_to_ptr.vmem [resolvable:$true] %s44_s8 }
   0xb   :  { %s971_s12 = smov 48   ;;  %s972_s13 = smov [#allocation8]  }
   0xc   :  { %50 = dma.hbm_to_vmem [thread:$0]  %s43_s7, 12288, %s45_s8, [#allocation6], %s970_s11, %s970_s11, %s971_s12  }
   0xd   :  { %s57_s14 = sshll.u32 %s972_s13, 4  ;;  %s973_s15 = smov 256   ;;  %s58_s14 = int_to_ptr.vmem [resolvable:$true] %s57_s14 }
   0xe   :  { %s974_s16 = smov 16  }
   0xf   :  { %63 = dma.hbm_to_vmem [thread:$0]  %s56_s0, 24576, %s58_s14, [#allocation9], %s973_s15, %s973_s15, %s974_s16  }
  0x10   :  { %957 = dma.done.wait [#allocation3], 16  }
  0x11   :  { %958 = vsyncadd [#allocation3], 4294967280 }
  0x12   :  { %959 = dma.done.wait [#allocation6], 14336  }
  0x13   :  { %960 = vsyncadd [#allocation6], 4294952960 }
  0x14   :  { %961 = dma.done.wait [#allocation9], 24576  }
  0x15   :  { %962 = vsyncadd [#allocation9], 4294942720  ;;  %v99_v0 = vld [vmem:[#allocation5 + $0x78] sm:$0xff]  ;;  %v98_v1 = vld [vmem:[#allocation5 + $0x70] sm:$0xff]  ;;  %s812_s20 = sshll.u32 %s1054_s5, 4  ;;  %vm797_vm3 = vcmask 1040384   ;;  %s813_s20 = int_to_ptr.hbm [resolvable:$true] %s812_s20 }
  0x16   :  { %100 = vmatpush.msra.mxu0 %v99_v0  ;;  %v97_v2 = vld [vmem:[#allocation5 + $0x68] sm:$0xff]  ;;  %v96_v3 = vld [vmem:[#allocation5 + $0x60] sm:$0xff]  ;;  %v95_v4 = vld [vmem:[#allocation5 + $0x58] sm:$0xff] }
  0x17   :  { %v222_v5 = vld [vmem:[#allocation7 + $0x2d0] sm:$0xff]  ;;  %v223_v6 = vld [vmem:[#allocation7 + $0x2d8] sm:$0xff]  ;;  %v216_v7 = vld [vmem:[#allocation7 + $0x2a0] sm:$0xff] }
  0x18   :  { %101 = vmatpush.msra.mxu0 %v98_v1  ;;  %228 = vmatpush.msra.mxu1 %v222_v5  ;;  %v217_v8 = vld [vmem:[#allocation7 + $0x2a8] sm:$0xff]  ;;  %v210_v9 = vld [vmem:[#allocation7 + $0x270] sm:$0xff]  ;;  %v211_v11 = vld [vmem:[#allocation7 + $0x278] sm:$0xff] }
  0x19   :  { %248 = vmatpush.msra.mxu2 %v223_v6  ;;  %v94_v10 = vld [vmem:[#allocation5 + $0x50] sm:$0xff]  ;;  %v204_v12 = vld [vmem:[#allocation7 + $0x240] sm:$0xff]  ;;  %v93_v13 = vld [vmem:[#allocation5 + $0x48] sm:$0xff] }
  0x1a   :  { %102 = vmatpush.msra.mxu0 %v97_v2  ;;  %229 = vmatpush.msra.mxu1 %v216_v7  ;;  %v205_v14 = vld [vmem:[#allocation7 + $0x248] sm:$0xff]  ;;  %v198_v15 = vld [vmem:[#allocation7 + $0x210] sm:$0xff]  ;;  %v92_v16 = vld [vmem:[#allocation5 + $0x40] sm:$0xff] }
  0x1b   :  { %249 = vmatpush.msra.mxu2 %v217_v8  ;;  %v199_v17 = vld [vmem:[#allocation7 + $0x218] sm:$0xff]  ;;  %v192_v18 = vld [vmem:[#allocation7 + $0x1e0] sm:$0xff]  ;;  %v193_v21 = vld [vmem:[#allocation7 + $0x1e8] sm:$0xff] }
  0x1c   :  { %103 = vmatpush.msra.mxu0 %v96_v3  ;;  %230 = vmatpush.msra.mxu1 %v210_v9  ;;  %v224_v19 = vld [vmem:[#allocation7 + $0x2e0] sm:$0xff]  ;;  %v91_v20 = vld [vmem:[#allocation5 + $0x38] sm:$0xff]  ;;  %v186_v22 = vld [vmem:[#allocation7 + $0x1b0] sm:$0xff] }
  0x1d   :  { %250 = vmatpush.msra.mxu2 %v211_v11  ;;  %268 = vmatpush.msra.mxu3 %v224_v19  ;;  %v218_v23 = vld [vmem:[#allocation7 + $0x2b0] sm:$0xff]  ;;  %v187_v25 = vld [vmem:[#allocation7 + $0x1b8] sm:$0xff]  ;;  %v212_v26 = vld [vmem:[#allocation7 + $0x280] sm:$0xff] }
  0x1e   :  { %104 = vmatpush.msra.mxu0 %v95_v4  ;;  %231 = vmatpush.msra.mxu1 %v204_v12  ;;  %v90_v24 = vld [vmem:[#allocation5 + $0x30] sm:$0xff]  ;;  %v180_v27 = vld [vmem:[#allocation7 + $0x180] sm:$0xff]  ;;  %v89_v29 = vld [vmem:[#allocation5 + $0x28] sm:$0xff] }
  0x1f   :  { %251 = vmatpush.msra.mxu2 %v205_v14  ;;  %269 = vmatpush.msra.mxu3 %v218_v23  ;;  %v206_v28 = vld [vmem:[#allocation7 + $0x250] sm:$0xff]  ;;  %v181_v30 = vld [vmem:[#allocation7 + $0x188] sm:$0xff]  ;;  %v88_v32 = vld [vmem:[#allocation5 + $0x20] sm:$0xff] }
  0x20   :  { %105 = vmatpush.msra.mxu0 %v94_v10  ;;  %232 = vmatpush.msra.mxu1 %v198_v15  ;;  %v174_v31 = vld [vmem:[#allocation7 + $0x150] sm:$0xff]  ;;  %v175_v33 = vld [vmem:[#allocation7 + $0x158] sm:$0xff]  ;;  %v168_v34 = vld [vmem:[#allocation7 + $0x120] sm:$0xff] }
  0x21   :  { %252 = vmatpush.msra.mxu2 %v199_v17  ;;  %270 = vmatpush.msra.mxu3 %v212_v26  ;;  %v87_v35 = vld [vmem:[#allocation5 + $0x18] sm:$0xff]  ;;  %v169_v36 = vld [vmem:[#allocation7 + $0x128] sm:$0xff]  ;;  %v162_v37 = vld [vmem:[#allocation7 + $0xf0] sm:$0xff] }
  0x22   :  { %106 = vmatpush.msra.mxu0 %v93_v13  ;;  %233 = vmatpush.msra.mxu1 %v192_v18  ;;  %v86_v38 = vld [vmem:[#allocation5 + $0x10] sm:$0xff]  ;;  %v163_v39 = vld [vmem:[#allocation7 + $0xf8] sm:$0xff]  ;;  %v156_v41 = vld [vmem:[#allocation7 + $0xc0] sm:$0xff] }
  0x23   :  { %253 = vmatpush.msra.mxu2 %v193_v21  ;;  %271 = vmatpush.msra.mxu3 %v206_v28  ;;  %v1018_v40 = vld [vmem:[#allocation2] sm:$0x1]  ;;  %v85_v42 = vld [vmem:[#allocation5 + $0x8] sm:$0xff]  ;;  %v150_v44 = vld [vmem:[#allocation7 + $0x90] sm:$0xff] }
  0x24   :  { %107 = vmatpush.msra.mxu0 %v92_v16  ;;  %234 = vmatpush.msra.mxu1 %v186_v22  ;;  %v157_v43 = vld [vmem:[#allocation7 + $0xc8] sm:$0xff]  ;;  %v84_v45 = vld [vmem:[#allocation5] sm:$0xff]  ;;  %v83_v46 = vmul.f32 %v1018_v40, %v1018_v40  ;;  %v151_v47 = vld [vmem:[#allocation7 + $0x98] sm:$0xff] }
  0x25   :  { %254 = vmatpush.msra.mxu2 %v187_v25  ;;  %v144_v48 = vld [vmem:[#allocation7 + $0x60] sm:$0xff]  ;;  %v225_v49 = vld [vmem:[#allocation7 + $0x2e8] sm:$0xff]  ;;  %v138_v51 = vld [vmem:[#allocation7 + $0x30] sm:$0xff] }
  0x26   :  { %108 = vmatpush.msra.mxu0 %v91_v20  ;;  %235 = vmatpush.msra.mxu1 %v180_v27  ;;  %v145_v50 = vld [vmem:[#allocation7 + $0x68] sm:$0xff]  ;;  %v219_v52 = vld [vmem:[#allocation7 + $0x2b8] sm:$0xff]  ;;  %v132_v54 = vld [vmem:[#allocation7] sm:$0xff] }
  0x27   :  { %255 = vmatpush.msra.mxu2 %v181_v30  ;;  %v139_v53 = vld [vmem:[#allocation7 + $0x38] sm:$0xff]  ;;  %v213_v55 = vld [vmem:[#allocation7 + $0x288] sm:$0xff]  ;;  %v200_v58 = vld [vmem:[#allocation7 + $0x220] sm:$0xff] }
  0x28   :  { %109 = vmatpush.msra.mxu0 %v90_v24  ;;  %236 = vmatpush.msra.mxu1 %v174_v31  ;;  %v133_v56 = vld [vmem:[#allocation7 + $0x8] sm:$0xff]  ;;  %v207_v57 = vld [vmem:[#allocation7 + $0x258] sm:$0xff]  ;;  %v226_v60 = vld [vmem:[#allocation7 + $0x2f0] sm:$0xff] }
  0x29   :  { %256 = vmatpush.msra.mxu2 %v175_v33  ;;  %v201_v59 = vld [vmem:[#allocation7 + $0x228] sm:$0xff]  ;;  %272 = vmatpush.msra.mxu3 %v200_v58  ;;  %v227_v61 = vld [vmem:[#allocation7 + $0x2f8] sm:$0xff]  ;;  %v194_v62 = vld [vmem:[#allocation7 + $0x1f0] sm:$0xff] }
  0x2a   :  { %110 = vmatpush.msra.mxu0 %v89_v29  ;;  %237 = vmatpush.msra.mxu1 %v168_v34  ;;  %v195_v63 = vld [vmem:[#allocation7 + $0x1f8] sm:$0xff]  ;;  %v220_v0 = vld [vmem:[#allocation7 + $0x2c0] sm:$0xff]  ;;  %v221_v1 = vld [vmem:[#allocation7 + $0x2c8] sm:$0xff] }
  0x2b   :  { %257 = vmatpush.msra.mxu2 %v169_v36  ;;  %273 = vmatpush.msra.mxu3 %v194_v62  ;;  %v188_v2 = vld [vmem:[#allocation7 + $0x1c0] sm:$0xff]  ;;  %v189_v3 = vld [vmem:[#allocation7 + $0x1c8] sm:$0xff]  ;;  %v214_v4 = vld [vmem:[#allocation7 + $0x290] sm:$0xff] }
  0x2c   :  { %111 = vmatpush.msra.mxu0 %v88_v32  ;;  %238 = vmatpush.msra.mxu1 %v162_v37  ;;  %v215_v5 = vld [vmem:[#allocation7 + $0x298] sm:$0xff]  ;;  %v182_v6 = vld [vmem:[#allocation7 + $0x190] sm:$0xff]  ;;  %v208_v8 = vld [vmem:[#allocation7 + $0x260] sm:$0xff] }
  0x2d   :  { %258 = vmatpush.msra.mxu2 %v163_v39  ;;  %274 = vmatpush.msra.mxu3 %v188_v2  ;;  %v183_v7 = vld [vmem:[#allocation7 + $0x198] sm:$0xff]  ;;  %v209_v9 = vld [vmem:[#allocation7 + $0x268] sm:$0xff]  ;;  %v176_v10 = vld [vmem:[#allocation7 + $0x160] sm:$0xff] }
  0x2e   :  { %112 = vmatpush.msra.mxu0 %v87_v35  ;;  %239 = vmatpush.msra.mxu1 %v156_v41  ;;  %v177_v11 = vld [vmem:[#allocation7 + $0x168] sm:$0xff]  ;;  %v202_v12 = vld [vmem:[#allocation7 + $0x230] sm:$0xff]  ;;  %v203_v13 = vld [vmem:[#allocation7 + $0x238] sm:$0xff] }
  0x2f   :  { %259 = vmatpush.msra.mxu2 %v157_v43  ;;  %275 = vmatpush.msra.mxu3 %v182_v6  ;;  %v170_v14 = vld [vmem:[#allocation7 + $0x130] sm:$0xff]  ;;  %v171_v15 = vld [vmem:[#allocation7 + $0x138] sm:$0xff]  ;;  %v196_v16 = vld [vmem:[#allocation7 + $0x200] sm:$0xff] }
  0x30   :  { %113 = vmatpush.msra.mxu0 %v86_v38  ;;  %240 = vmatpush.msra.mxu1 %v150_v44  ;;  %v197_v17 = vld [vmem:[#allocation7 + $0x208] sm:$0xff]  ;;  %v164_v18 = vld [vmem:[#allocation7 + $0x100] sm:$0xff]  ;;  %v190_v20 = vld [vmem:[#allocation7 + $0x1d0] sm:$0xff] }
  0x31   :  { %260 = vmatpush.msra.mxu2 %v151_v47  ;;  %276 = vmatpush.msra.mxu3 %v176_v10  ;;  %v165_v19 = vld [vmem:[#allocation7 + $0x108] sm:$0xff]  ;;  %v191_v21 = vld [vmem:[#allocation7 + $0x1d8] sm:$0xff]  ;;  %v158_v22 = vld [vmem:[#allocation7 + $0xd0] sm:$0xff] }
  0x32   :  { %114 = vmatpush.msra.mxu0 %v85_v42  ;;  %241 = vmatpush.msra.mxu1 %v144_v48  ;;  %v159_v23 = vld [vmem:[#allocation7 + $0xd8] sm:$0xff]  ;;  %v184_v24 = vld [vmem:[#allocation7 + $0x1a0] sm:$0xff]  ;;  %v185_v25 = vld [vmem:[#allocation7 + $0x1a8] sm:$0xff] }
  0x33   :  { %261 = vmatpush.msra.mxu2 %v145_v50  ;;  %277 = vmatpush.msra.mxu3 %v170_v14  ;;  %v152_v26 = vld [vmem:[#allocation7 + $0xa0] sm:$0xff]  ;;  %v153_v27 = vld [vmem:[#allocation7 + $0xa8] sm:$0xff]  ;;  %v178_v28 = vld [vmem:[#allocation7 + $0x170] sm:$0xff] }
  0x34   :  { %115 = vmatpush.msra.mxu0 %v84_v45  ;;  %242 = vmatpush.msra.mxu1 %v138_v51  ;;  %v179_v29 = vld [vmem:[#allocation7 + $0x178] sm:$0xff]  ;;  %v146_v30 = vld [vmem:[#allocation7 + $0x70] sm:$0xff]  ;;  %v172_v32 = vld [vmem:[#allocation7 + $0x140] sm:$0xff] }
  0x35   :  { %116 = vmatmul.f32.vlgmr.msra.gmra.mxu0 %v83_v46  ;;  %262 = vmatpush.msra.mxu2 %v139_v53  ;;  %v147_v31 = vld [vmem:[#allocation7 + $0x78] sm:$0xff]  ;;  %v173_v33 = vld [vmem:[#allocation7 + $0x148] sm:$0xff]  ;;  %v140_v34 = vld [vmem:[#allocation7 + $0x40] sm:$0xff] }
  0x36   :  { %288 = vmatpush.msrb.mxu0 %v225_v49  ;;  %243 = vmatpush.msra.mxu1 %v132_v54  ;;  %v141_v35 = vld [vmem:[#allocation7 + $0x48] sm:$0xff]  ;;  %v166_v36 = vld [vmem:[#allocation7 + $0x110] sm:$0xff]  ;;  %v167_v37 = vld [vmem:[#allocation7 + $0x118] sm:$0xff] }
  0x37   :  { %263 = vmatpush.msra.mxu2 %v133_v56  ;;  %278 = vmatpush.msra.mxu3 %v164_v18  ;;  %v134_v38 = vld [vmem:[#allocation7 + $0x10] sm:$0xff]  ;;  %v135_v39 = vld [vmem:[#allocation7 + $0x18] sm:$0xff]  ;;  %v160_v41 = vld [vmem:[#allocation7 + $0xe0] sm:$0xff] }
  0x38   :  { %289 = vmatpush.msrb.mxu0 %v219_v52  ;;  %308 = vmatpush.msrb.mxu1 %v226_v60  ;;  %v161_v42 = vld [vmem:[#allocation7 + $0xe8] sm:$0xff]  ;;  %v154_v43 = vld [vmem:[#allocation7 + $0xb0] sm:$0xff]  ;;  %v155_v44 = vld [vmem:[#allocation7 + $0xb8] sm:$0xff] }
  0x39   :  { %328 = vmatpush.msrb.mxu2 %v227_v61  ;;  %279 = vmatpush.msra.mxu3 %v158_v22  ;;  %v148_v45 = vld [vmem:[#allocation7 + $0x80] sm:$0xff]  ;;  %v149_v46 = vld [vmem:[#allocation7 + $0x88] sm:$0xff]  ;;  %v142_v47 = vld [vmem:[#allocation7 + $0x50] sm:$0xff] }
  0x3a   :  { %290 = vmatpush.msrb.mxu0 %v213_v55  ;;  %309 = vmatpush.msrb.mxu1 %v220_v0  ;;  %v143_v48 = vld [vmem:[#allocation7 + $0x58] sm:$0xff]  ;;  %v136_v49 = vld [vmem:[#allocation7 + $0x20] sm:$0xff]  ;;  %v137_v50 = vld [vmem:[#allocation7 + $0x28] sm:$0xff] }
  0x3b   :  { %329 = vmatpush.msrb.mxu2 %v221_v1  ;;  %280 = vmatpush.msra.mxu3 %v152_v26  ;;  %v384_v51 = vld [vmem:[#allocation8 + $0xf0] sm:$0xff]  ;;  %v382_v52 = vld [vmem:[#allocation8 + $0xe0] sm:$0xff] }
  0x3c   :  { %291 = vmatpush.msrb.mxu0 %v207_v57  ;;  %310 = vmatpush.msrb.mxu1 %v214_v4  ;;  %v380_v55 = vld [vmem:[#allocation8 + $0xd0] sm:$0xff]  ;;  %v414_v57 = vld [vmem:[#allocation8 + $0x1e0] sm:$0xff] }
  0x3d   :  { %330 = vmatpush.msrb.mxu2 %v215_v5  ;;  %281 = vmatpush.msra.mxu3 %v146_v30  ;;  %v416_v56 = vld [vmem:[#allocation8 + $0x1f0] sm:$0xff]  ;;  %v378_v58 = vld [vmem:[#allocation8 + $0xc0] sm:$0xff] }
  0x3e   :  { %292 = vmatpush.msrb.mxu0 %v201_v59  ;;  %311 = vmatpush.msrb.mxu1 %v208_v8  ;;  %v412_v59 = vld [vmem:[#allocation8 + $0x1d0] sm:$0xff]  ;;  %v410_v61 = vld [vmem:[#allocation8 + $0x1c0] sm:$0xff] }
  0x3f   :  { %331 = vmatpush.msrb.mxu2 %v209_v9  ;;  %282 = vmatpush.msra.mxu3 %v140_v34  ;;  %v376_v60 = vld [vmem:[#allocation8 + $0xb0] sm:$0xff]  ;;  %v374_v62 = vld [vmem:[#allocation8 + $0xa0] sm:$0xff] }
  0x40   :  { %293 = vmatpush.msrb.mxu0 %v195_v63  ;;  %312 = vmatpush.msrb.mxu1 %v202_v12  ;;  %v408_v63 = vld [vmem:[#allocation8 + $0x1b0] sm:$0xff]  ;;  %v406_v2 = vld [vmem:[#allocation8 + $0x1a0] sm:$0xff] }
  0x41   :  { %332 = vmatpush.msrb.mxu2 %v203_v13  ;;  %283 = vmatpush.msra.mxu3 %v134_v38  ;;  %v372_v1 = vld [vmem:[#allocation8 + $0x90] sm:$0xff]  ;;  %v370_v4 = vld [vmem:[#allocation8 + $0x80] sm:$0xff] }
  0x42   :  { %294 = vmatpush.msrb.mxu0 %v189_v3  ;;  %313 = vmatpush.msrb.mxu1 %v196_v16  ;;  %v404_v5 = vld [vmem:[#allocation8 + $0x190] sm:$0xff]  ;;  %v402_v8 = vld [vmem:[#allocation8 + $0x180] sm:$0xff] }
  0x43   :  { %333 = vmatpush.msrb.mxu2 %v197_v17  ;;  %552 = vmatpush.msrb.mxu3 %v384_v51  ;;  %v366_v10 = vld [vmem:[#allocation8 + $0x60] sm:$0xff]  ;;  %v364_v13 = vld [vmem:[#allocation8 + $0x50] sm:$0xff] }
  0x44   :  { %295 = vmatpush.msrb.mxu0 %v183_v7  ;;  %314 = vmatpush.msrb.mxu1 %v190_v20  ;;  %v368_v7 = vld [vmem:[#allocation8 + $0x70] sm:$0xff]  ;;  %v398_v14 = vld [vmem:[#allocation8 + $0x160] sm:$0xff] }
  0x45   :  { %334 = vmatpush.msrb.mxu2 %v191_v21  ;;  %553 = vmatpush.msrb.mxu3 %v382_v52  ;;  %v362_v16 = vld [vmem:[#allocation8 + $0x40] sm:$0xff]  ;;  %v396_v17 = vld [vmem:[#allocation8 + $0x150] sm:$0xff] }
  0x46   :  { %296 = vmatpush.msrb.mxu0 %v177_v11  ;;  %315 = vmatpush.msrb.mxu1 %v184_v24  ;;  %v400_v11 = vld [vmem:[#allocation8 + $0x170] sm:$0xff]  ;;  %v478_v24 = vld [vmem:[#allocation8 + $0x3e0] sm:$0xff] }
  0x47   :  { %335 = vmatpush.msrb.mxu2 %v185_v25  ;;  %554 = vmatpush.msrb.mxu3 %v380_v55  ;;  %v480_v20 = vld [vmem:[#allocation8 + $0x3f0] sm:$0xff]  ;;  %v446_v25 = vld [vmem:[#allocation8 + $0x2e0] sm:$0xff] }
  0x48   :  { %297 = vmatpush.msrb.mxu0 %v171_v15  ;;  %316 = vmatpush.msrb.mxu1 %v178_v28  ;;  %v448_v21 = vld [vmem:[#allocation8 + $0x2f0] sm:$0xff]  ;;  %v358_v26 = vld [vmem:[#allocation8 + $0x20] sm:$0xff] }
  0x49   :  { %336 = vmatpush.msrb.mxu2 %v179_v29  ;;  %555 = vmatpush.msrb.mxu3 %v378_v58  ;;  %v360_v22 = vld [vmem:[#allocation8 + $0x30] sm:$0xff]  ;;  %v390_v30 = vld [vmem:[#allocation8 + $0x120] sm:$0xff] }
  0x4a   :  { %298 = vmatpush.msrb.mxu0 %v165_v19  ;;  %317 = vmatpush.msrb.mxu1 %v172_v32  ;;  %v476_v28 = vld [vmem:[#allocation8 + $0x3d0] sm:$0xff]  ;;  %v442_v32 = vld [vmem:[#allocation8 + $0x2c0] sm:$0xff] }
  0x4b   :  { %337 = vmatpush.msrb.mxu2 %v173_v33  ;;  %556 = vmatpush.msrb.mxu3 %v376_v60  ;;  %v444_v29 = vld [vmem:[#allocation8 + $0x2d0] sm:$0xff]  ;;  %v354_v33 = vld [vmem:[#allocation8] sm:$0xff] }
  0x4c   :  { %299 = vmatpush.msrb.mxu0 %v159_v23  ;;  %318 = vmatpush.msrb.mxu1 %v166_v36  ;;  %v394_v23 = vld [vmem:[#allocation8 + $0x140] sm:$0xff]  ;;  %v388_v34 = vld [vmem:[#allocation8 + $0x110] sm:$0xff] }
  0x4d   :  { %338 = vmatpush.msrb.mxu2 %v167_v37  ;;  %557 = vmatpush.msrb.mxu3 %v374_v62  ;;  %v440_v36 = vld [vmem:[#allocation8 + $0x2b0] sm:$0xff]  ;;  %v386_v38 = vld [vmem:[#allocation8 + $0x100] sm:$0xff] }
  0x4e   :  { %300 = vmatpush.msrb.mxu0 %v153_v27  ;;  %319 = vmatpush.msrb.mxu1 %v160_v41  ;;  %v392_v27 = vld [vmem:[#allocation8 + $0x130] sm:$0xff]  ;;  %v438_v41 = vld [vmem:[#allocation8 + $0x2a0] sm:$0xff] }
  0x4f   :  { %339 = vmatpush.msrb.mxu2 %v161_v42  ;;  %558 = vmatpush.msrb.mxu3 %v372_v1  ;;  %v512_v37 = vld [vmem:[#allocation8 + $0x4f0] sm:$0xff]  ;;  %v510_v42 = vld [vmem:[#allocation8 + $0x4e0] sm:$0xff] }
  0x50   :  { %301 = vmatpush.msrb.mxu0 %v147_v31  ;;  %320 = vmatpush.msrb.mxu1 %v154_v43  ;;  %v474_v31 = vld [vmem:[#allocation8 + $0x3c0] sm:$0xff]  ;;  %v544_v43 = vld [vmem:[#allocation8 + $0x5f0] sm:$0xff] }
  0x51   :  { %340 = vmatpush.msrb.mxu2 %v155_v44  ;;  %559 = vmatpush.msrb.mxu3 %v370_v4  ;;  %v468_v44 = vld [vmem:[#allocation8 + $0x390] sm:$0xff]  ;;  %v538_v55 = vld [vmem:[#allocation8 + $0x5c0] sm:$0xff] }
  0x52   :  { %302 = vmatpush.msrb.mxu0 %v141_v35  ;;  %321 = vmatpush.msrb.mxu1 %v148_v45  ;;  %v472_v35 = vld [vmem:[#allocation8 + $0x3b0] sm:$0xff]  ;;  %v502_v58 = vld [vmem:[#allocation8 + $0x4a0] sm:$0xff] }
  0x53   :  { %341 = vmatpush.msrb.mxu2 %v149_v46  ;;  %560 = vmatpush.msrb.mxu3 %v368_v7  ;;  %v436_v45 = vld [vmem:[#allocation8 + $0x290] sm:$0xff]  ;;  %v426_v1 = vld [vmem:[#allocation8 + $0x240] sm:$0xff] }
  0x54   :  { %303 = vmatpush.msrb.mxu0 %v135_v39  ;;  %322 = vmatpush.msrb.mxu1 %v142_v47  ;;  %v470_v39 = vld [vmem:[#allocation8 + $0x3a0] sm:$0xff]  ;;  %v508_v46 = vld [vmem:[#allocation8 + $0x4d0] sm:$0xff] }
  0x55   :  { %342 = vmatpush.msrb.mxu2 %v143_v48  ;;  %561 = vmatpush.msrb.mxu3 %v366_v10  ;;  %v542_v47 = vld [vmem:[#allocation8 + $0x5e0] sm:$0xff]  ;;  %v540_v51 = vld [vmem:[#allocation8 + $0x5d0] sm:$0xff] }
  0x56   :  { %323 = vmatpush.msrb.mxu1 %v136_v49  ;;  %572 = vmatpush.msra.mxu0 %v416_v56  ;;  %v466_v48 = vld [vmem:[#allocation8 + $0x380] sm:$0xff]  ;;  %v464_v52 = vld [vmem:[#allocation8 + $0x370] sm:$0xff] }
  0x57   :  { %343 = vmatpush.msrb.mxu2 %v137_v50  ;;  %562 = vmatpush.msrb.mxu3 %v364_v13  ;;  %v434_v49 = vld [vmem:[#allocation8 + $0x280] sm:$0xff]  ;;  %v460_v60 = vld [vmem:[#allocation8 + $0x350] sm:$0xff] }
  0x58   :  { %573 = vmatpush.msra.mxu0 %v414_v57  ;;  %v506_v50 = vld [vmem:[#allocation8 + $0x4c0] sm:$0xff]  ;;  %v500_v62 = vld [vmem:[#allocation8 + $0x490] sm:$0xff] }
  0x59   :  { %563 = vmatpush.msrb.mxu3 %v362_v16  ;;  %v462_v56 = vld [vmem:[#allocation8 + $0x360] sm:$0xff]  ;;  %v456_v4 = vld [vmem:[#allocation8 + $0x330] sm:$0xff] }
  0x5a   :  { %574 = vmatpush.msra.mxu0 %v412_v59  ;;  %v430_v57 = vld [vmem:[#allocation8 + $0x260] sm:$0xff]  ;;  %v536_v59 = vld [vmem:[#allocation8 + $0x5b0] sm:$0xff] }
  0x5b   :  { %564 = vmatpush.msrb.mxu3 %v360_v22  ;;  %v530_v7 = vld [vmem:[#allocation8 + $0x580] sm:$0xff]  ;;  %v420_v13 = vld [vmem:[#allocation8 + $0x210] sm:$0xff]  ;;  %v415_v22 = vld [vmem:[#allocation8 + $0x1e8] sm:$0xff] }
  0x5c   :  { %575 = vmatpush.msra.mxu0 %v410_v61  ;;  %v428_v61 = vld [vmem:[#allocation8 + $0x250] sm:$0xff]  ;;  %v494_v10 = vld [vmem:[#allocation8 + $0x460] sm:$0xff] }
  0x5d   :  { %565 = vmatpush.msrb.mxu3 %v358_v26  ;;  %v450_v16 = vld [vmem:[#allocation8 + $0x300] sm:$0xff]  ;;  %v381_v26 = vld [vmem:[#allocation8 + $0xd8] sm:$0xff] }
  0x5e   :  { %576 = vmatpush.msra.mxu0 %v408_v63  ;;  %v534_v63 = vld [vmem:[#allocation8 + $0x5a0] sm:$0xff] }
  0x60   :  { %577 = vmatpush.msra.mxu0 %v406_v2  ;;  %v498_v2 = vld [vmem:[#allocation8 + $0x480] sm:$0xff] }
  0x62   :  { %578 = vmatpush.msra.mxu0 %v404_v5  ;;  %v424_v5 = vld [vmem:[#allocation8 + $0x230] sm:$0xff] }
  0x64   :  { %579 = vmatpush.msra.mxu0 %v402_v8  ;;  %v454_v8 = vld [vmem:[#allocation8 + $0x320] sm:$0xff] }
  0x66   :  { %580 = vmatpush.msra.mxu0 %v400_v11  ;;  %v528_v11 = vld [vmem:[#allocation8 + $0x570] sm:$0xff] }
  0x68   :  { %581 = vmatpush.msra.mxu0 %v398_v14  ;;  %v492_v14 = vld [vmem:[#allocation8 + $0x450] sm:$0xff] }
  0x6a   :  { %582 = vmatpush.msra.mxu0 %v396_v17  ;;  %v418_v17 = vld [vmem:[#allocation8 + $0x200] sm:$0xff] }
  0x6c   :  { %583 = vmatpush.msra.mxu0 %v394_v23  ;;  %v383_v23 = vld [vmem:[#allocation8 + $0xe8] sm:$0xff] }
  0x6e   :  { %584 = vmatpush.msra.mxu0 %v392_v27  ;;  %v486_v27 = vld [vmem:[#allocation8 + $0x420] sm:$0xff] }
  0x70   :  { %585 = vmatpush.msra.mxu0 %v390_v30  ;;  %v377_v30 = vld [vmem:[#allocation8 + $0xb8] sm:$0xff] }
  0x72   :  { %586 = vmatpush.msra.mxu0 %v388_v34  ;;  %v373_v34 = vld [vmem:[#allocation8 + $0x98] sm:$0xff] }
  0x74   :  { %587 = vmatpush.msra.mxu0 %v386_v38  ;;  %v369_v38 = vld [vmem:[#allocation8 + $0x78] sm:$0xff] }
  0xb2   :  { %v117_v53 = vpop.f32.mrf.mxu0 }
  0xb3   :  { %v120_v54 = vmax.f32 %v117_v53, 1e-30  ;;  %v432_v53 = vld [vmem:[#allocation8 + $0x270] sm:$0xff] }
  0xb5   :  { %835 = vrsqrt.f32 %v120_v54  ;;  %vm127_vm1 = vweird.f32 %v120_v54 }
  0xbb   :  { %v836_v0 = vpop.eup %835 }
  0xbc   :  { %v122_v3 = vmul.f32 %v836_v0, %v120_v54  ;;  %vm128_vm0 = vweird.f32 %v836_v0  ;;  %v504_v54 = vld [vmem:[#allocation8 + $0x4b0] sm:$0xff] }
  0xbd   :  { %vm129_vm2 = vmor %vm127_vm1, %vm128_vm0 }
  0xbe   :  { %v123_v6 = vmul.f32 %v836_v0, %v122_v3  ;;  %v532_v3 = vld [vmem:[#allocation8 + $0x590] sm:$0xff] }
  0xc0   :  { %v124_v9 = vmul.f32 0.5, %v123_v6  ;;  %v496_v6 = vld [vmem:[#allocation8 + $0x470] sm:$0xff] }
  0xc2   :  { %v125_v12 = vsub.f32 1.5, %v124_v9  ;;  %v422_v9 = vld [vmem:[#allocation8 + $0x220] sm:$0xff] }
  0xc4   :  { %v126_v15 = vmul.f32 %v836_v0, %v125_v12  ;;  %v452_v12 = vld [vmem:[#allocation8 + $0x310] sm:$0xff] }
  0xc6   :  { %v130_v18 = vsel %vm129_vm2, %v836_v0, %v126_v15  ;;  %v458_v0 = vld [vmem:[#allocation8 + $0x340] sm:$0xff] }
  0xc7   :  { %v131_v19 = vmul.f32 %v130_v18, %v1018_v40  ;;  %v356_v40 = vld [vmem:[#allocation8 + $0x10] sm:$0xff]  ;;  %v526_v15 = vld [vmem:[#allocation8 + $0x560] sm:$0xff]  ;;  %v417_v18 = vld [vmem:[#allocation8 + $0x1f8] sm:$0xff] }
  0xc8   :  { %566 = vmatpush.msrb.mxu3 %v356_v40  ;;  %v409_v40 = vld [vmem:[#allocation8 + $0x1b8] sm:$0xff] }
  0xc9   :  { %244 = vmatmul.f32.vlgmr.msra.gmra.mxu1 %v131_v19  ;;  %264 = vmatmul.f32.vlgmr.msra.gmra.mxu2 %v131_v19 }
  0xca   :  { %284 = vmatmul.f32.vlgmr.msra.gmra.mxu3 %v131_v19  ;;  %304 = vmatmul.f32.vlgmr.msrb.gmra.mxu0 %v131_v19 }
  0xcb   :  { %612 = vmatpush.msra.mxu2 %v480_v20  ;;  %592 = vmatpush.msra.mxu1 %v448_v21  ;;  %v490_v20 = vld [vmem:[#allocation8 + $0x440] sm:$0xff]  ;;  %v524_v21 = vld [vmem:[#allocation8 + $0x550] sm:$0xff] }
  0xcc   :  { %567 = vmatpush.msrb.mxu3 %v354_v33  ;;  %652 = vmatpush.msrb.mxu0 %v544_v43  ;;  %v405_v33 = vld [vmem:[#allocation8 + $0x198] sm:$0xff] }
  0xcd   :  { %613 = vmatpush.msra.mxu2 %v478_v24  ;;  %593 = vmatpush.msra.mxu1 %v446_v25  ;;  %v488_v24 = vld [vmem:[#allocation8 + $0x430] sm:$0xff]  ;;  %v413_v25 = vld [vmem:[#allocation8 + $0x1d8] sm:$0xff] }
  0xce   :  { %632 = vmatpush.msra.mxu3 %v512_v37  ;;  %653 = vmatpush.msrb.mxu0 %v542_v47  ;;  %v401_v37 = vld [vmem:[#allocation8 + $0x178] sm:$0xff]  ;;  %v484_v47 = vld [vmem:[#allocation8 + $0x410] sm:$0xff] }
  0xcf   :  { %614 = vmatpush.msra.mxu2 %v476_v28  ;;  %594 = vmatpush.msra.mxu1 %v444_v29  ;;  %v411_v28 = vld [vmem:[#allocation8 + $0x1c8] sm:$0xff]  ;;  %v365_v43 = vld [vmem:[#allocation8 + $0x58] sm:$0xff] }
  0xd0   :  { %633 = vmatpush.msra.mxu3 %v510_v42  ;;  %654 = vmatpush.msrb.mxu0 %v540_v51  ;;  %v379_v29 = vld [vmem:[#allocation8 + $0xc8] sm:$0xff]  ;;  %v397_v42 = vld [vmem:[#allocation8 + $0x158] sm:$0xff]  ;;  %v482_v51 = vld [vmem:[#allocation8 + $0x400] sm:$0xff] }
  0xd1   :  { %324 = vmatmul.f32.vlgmr.msrb.gmra.mxu1 %v131_v19  ;;  %344 = vmatmul.f32.vlgmr.msrb.gmra.mxu2 %v131_v19  ;;  %v385_v19 = vld [vmem:[#allocation8 + $0xf8] sm:$0xff] }
  0xd2   :  { %615 = vmatpush.msra.mxu2 %v474_v31  ;;  %595 = vmatpush.msra.mxu1 %v442_v32  ;;  %v407_v31 = vld [vmem:[#allocation8 + $0x1a8] sm:$0xff] }
  0xd3   :  { %634 = vmatpush.msra.mxu3 %v508_v46  ;;  %655 = vmatpush.msrb.mxu0 %v538_v55  ;;  %v375_v32 = vld [vmem:[#allocation8 + $0xa8] sm:$0xff]  ;;  %v518_v55 = vld [vmem:[#allocation8 + $0x520] sm:$0xff] }
  0xd4   :  { %616 = vmatpush.msra.mxu2 %v472_v35  ;;  %596 = vmatpush.msra.mxu1 %v440_v36  ;;  %v403_v35 = vld [vmem:[#allocation8 + $0x188] sm:$0xff] }
  0xd5   :  { %635 = vmatpush.msra.mxu3 %v506_v50  ;;  %656 = vmatpush.msrb.mxu0 %v536_v59  ;;  %v371_v36 = vld [vmem:[#allocation8 + $0x88] sm:$0xff]  ;;  %v389_v50 = vld [vmem:[#allocation8 + $0x118] sm:$0xff]  ;;  %v514_v59 = vld [vmem:[#allocation8 + $0x500] sm:$0xff] }
  0xd6   :  { %617 = vmatpush.msra.mxu2 %v470_v39  ;;  %597 = vmatpush.msra.mxu1 %v438_v41  ;;  %v399_v39 = vld [vmem:[#allocation8 + $0x168] sm:$0xff] }
  0xd7   :  { %636 = vmatpush.msra.mxu3 %v504_v54  ;;  %657 = vmatpush.msrb.mxu0 %v534_v63  ;;  %v367_v41 = vld [vmem:[#allocation8 + $0x68] sm:$0xff] }
  0xd8   :  { %618 = vmatpush.msra.mxu2 %v468_v44  ;;  %598 = vmatpush.msra.mxu1 %v436_v45  ;;  %v395_v44 = vld [vmem:[#allocation8 + $0x148] sm:$0xff]  ;;  %v393_v45 = vld [vmem:[#allocation8 + $0x138] sm:$0xff] }
  0xd9   :  { %637 = vmatpush.msra.mxu3 %v502_v58  ;;  %658 = vmatpush.msrb.mxu0 %v532_v3  ;;  %v391_v46 = vld [vmem:[#allocation8 + $0x128] sm:$0xff]  ;;  %v357_v58 = vld [vmem:[#allocation8 + $0x18] sm:$0xff] }
  0xda   :  { %619 = vmatpush.msra.mxu2 %v466_v48  ;;  %599 = vmatpush.msra.mxu1 %v434_v49  ;;  %v522_v48 = vld [vmem:[#allocation8 + $0x540] sm:$0xff]  ;;  %v363_v49 = vld [vmem:[#allocation8 + $0x48] sm:$0xff] }
  0xdb   :  { %638 = vmatpush.msra.mxu3 %v500_v62  ;;  %659 = vmatpush.msrb.mxu0 %v530_v7  ;;  %v387_v54 = vld [vmem:[#allocation8 + $0x108] sm:$0xff]  ;;  %v541_v7 = vld [vmem:[#allocation8 + $0x5d8] sm:$0xff] }
  0xdc   :  { %620 = vmatpush.msra.mxu2 %v464_v52  ;;  %600 = vmatpush.msra.mxu1 %v432_v53  ;;  %v520_v52 = vld [vmem:[#allocation8 + $0x530] sm:$0xff]  ;;  %v361_v53 = vld [vmem:[#allocation8 + $0x38] sm:$0xff]  ;;  %v447_v3 = vld [vmem:[#allocation8 + $0x2e8] sm:$0xff] }
  0xdd   :  { %639 = vmatpush.msra.mxu3 %v498_v2  ;;  %660 = vmatpush.msrb.mxu0 %v528_v11  ;;  %v545_v2 = vld [vmem:[#allocation8 + $0x5f8] sm:$0xff] }
  0xde   :  { %621 = vmatpush.msra.mxu2 %v462_v56  ;;  %601 = vmatpush.msra.mxu1 %v430_v57  ;;  %v359_v56 = vld [vmem:[#allocation8 + $0x28] sm:$0xff]  ;;  %v516_v57 = vld [vmem:[#allocation8 + $0x510] sm:$0xff] }
  0xdf   :  { %640 = vmatpush.msra.mxu3 %v496_v6  ;;  %661 = vmatpush.msrb.mxu0 %v526_v15 }
  0xe0   :  { %622 = vmatpush.msra.mxu2 %v460_v60  ;;  %602 = vmatpush.msra.mxu1 %v428_v61  ;;  %v355_v60 = vld [vmem:[#allocation8 + $0x8] sm:$0xff] }
  0xe1   :  { %641 = vmatpush.msra.mxu3 %v494_v10  ;;  %662 = vmatpush.msrb.mxu0 %v524_v21  ;;  %v443_v10 = vld [vmem:[#allocation8 + $0x2c8] sm:$0xff] }
  0xe2   :  { %623 = vmatpush.msra.mxu2 %v458_v0  ;;  %603 = vmatpush.msra.mxu1 %v426_v1  ;;  %v449_v0 = vld [vmem:[#allocation8 + $0x2f8] sm:$0xff]  ;;  %v439_v21 = vld [vmem:[#allocation8 + $0x2a8] sm:$0xff] }
  0xe3   :  { %642 = vmatpush.msra.mxu3 %v492_v14  ;;  %663 = vmatpush.msrb.mxu0 %v522_v48  ;;  %v513_v14 = vld [vmem:[#allocation8 + $0x4f8] sm:$0xff] }
  0xe4   :  { %624 = vmatpush.msra.mxu2 %v456_v4  ;;  %604 = vmatpush.msra.mxu1 %v424_v5  ;;  %v543_v4 = vld [vmem:[#allocation8 + $0x5e8] sm:$0xff]  ;;  %v445_v5 = vld [vmem:[#allocation8 + $0x2d8] sm:$0xff] }
  0xe5   :  { %643 = vmatpush.msra.mxu3 %v490_v20  ;;  %664 = vmatpush.msrb.mxu0 %v520_v52  ;;  %v537_v20 = vld [vmem:[#allocation8 + $0x5b8] sm:$0xff]  ;;  %v463_v52 = vld [vmem:[#allocation8 + $0x368] sm:$0xff] }
  0xe6   :  { %625 = vmatpush.msra.mxu2 %v454_v8  ;;  %605 = vmatpush.msra.mxu1 %v422_v9  ;;  %v465_v48 = vld [vmem:[#allocation8 + $0x378] sm:$0xff] }
  0xe7   :  { %644 = vmatpush.msra.mxu3 %v488_v24  ;;  %665 = vmatpush.msrb.mxu0 %v518_v55  ;;  %v535_v24 = vld [vmem:[#allocation8 + $0x5a8] sm:$0xff] }
  0xe8   :  { %626 = vmatpush.msra.mxu2 %v452_v12  ;;  %606 = vmatpush.msra.mxu1 %v420_v13  ;;  %v481_v13 = vld [vmem:[#allocation8 + $0x3f8] sm:$0xff]  ;;  %v423_v55 = vld [vmem:[#allocation8 + $0x228] sm:$0xff] }
  0xe9   :  { %645 = vmatpush.msra.mxu3 %v486_v27  ;;  %666 = vmatpush.msrb.mxu0 %v516_v57  ;;  %v493_v57 = vld [vmem:[#allocation8 + $0x458] sm:$0xff] }
  0xea   :  { %627 = vmatpush.msra.mxu2 %v450_v16  ;;  %607 = vmatpush.msra.mxu1 %v418_v17  ;;  %v539_v16 = vld [vmem:[#allocation8 + $0x5c8] sm:$0xff]  ;;  %v441_v17 = vld [vmem:[#allocation8 + $0x2b8] sm:$0xff] }
  0xeb   :  { %646 = vmatpush.msra.mxu3 %v484_v47  ;;  %667 = vmatpush.msrb.mxu0 %v514_v59  ;;  %v427_v47 = vld [vmem:[#allocation8 + $0x248] sm:$0xff]  ;;  %v421_v59 = vld [vmem:[#allocation8 + $0x218] sm:$0xff] }
  0xec   :  { %692 = vmatpush.msrb.mxu2 %v417_v18  ;;  %672 = vmatpush.msrb.mxu1 %v385_v19  ;;  %v479_v18 = vld [vmem:[#allocation8 + $0x3e8] sm:$0xff] }
  0xed   :  { %647 = vmatpush.msra.mxu3 %v482_v51  ;;  %v511_v19 = vld [vmem:[#allocation8 + $0x4e8] sm:$0xff]  ;;  %v425_v51 = vld [vmem:[#allocation8 + $0x238] sm:$0xff] }
  0xee   :  { %693 = vmatpush.msrb.mxu2 %v415_v22  ;;  %673 = vmatpush.msrb.mxu1 %v383_v23  ;;  %v477_v22 = vld [vmem:[#allocation8 + $0x3d8] sm:$0xff] }
  0xef   :  { %v509_v23 = vld [vmem:[#allocation8 + $0x4d8] sm:$0xff] }
  0xf0   :  { %694 = vmatpush.msrb.mxu2 %v413_v25  ;;  %674 = vmatpush.msrb.mxu1 %v381_v26  ;;  %v437_v26 = vld [vmem:[#allocation8 + $0x298] sm:$0xff] }
  0xf2   :  { %695 = vmatpush.msrb.mxu2 %v411_v28  ;;  %675 = vmatpush.msrb.mxu1 %v379_v29  ;;  %v475_v28 = vld [vmem:[#allocation8 + $0x3c8] sm:$0xff] }
  0xf3   :  { %v507_v29 = vld [vmem:[#allocation8 + $0x4c8] sm:$0xff] }
  0xf4   :  { %696 = vmatpush.msrb.mxu2 %v409_v40  ;;  %676 = vmatpush.msrb.mxu1 %v377_v30  ;;  %v533_v40 = vld [vmem:[#allocation8 + $0x598] sm:$0xff]  ;;  %v435_v30 = vld [vmem:[#allocation8 + $0x288] sm:$0xff] }
  0xf6   :  { %697 = vmatpush.msrb.mxu2 %v407_v31  ;;  %677 = vmatpush.msrb.mxu1 %v375_v32  ;;  %v473_v31 = vld [vmem:[#allocation8 + $0x3b8] sm:$0xff] }
  0xf7   :  { %v505_v32 = vld [vmem:[#allocation8 + $0x4b8] sm:$0xff] }
  0xf8   :  { %698 = vmatpush.msrb.mxu2 %v405_v33  ;;  %678 = vmatpush.msrb.mxu1 %v373_v34  ;;  %v531_v33 = vld [vmem:[#allocation8 + $0x588] sm:$0xff]  ;;  %v433_v34 = vld [vmem:[#allocation8 + $0x278] sm:$0xff] }
  0xfa   :  { %699 = vmatpush.msrb.mxu2 %v403_v35  ;;  %679 = vmatpush.msrb.mxu1 %v371_v36  ;;  %v471_v35 = vld [vmem:[#allocation8 + $0x3a8] sm:$0xff] }
  0xfb   :  { %v503_v36 = vld [vmem:[#allocation8 + $0x4a8] sm:$0xff] }
  0xfc   :  { %700 = vmatpush.msrb.mxu2 %v401_v37  ;;  %680 = vmatpush.msrb.mxu1 %v369_v38  ;;  %v529_v37 = vld [vmem:[#allocation8 + $0x578] sm:$0xff]  ;;  %v431_v38 = vld [vmem:[#allocation8 + $0x268] sm:$0xff] }
  0xfe   :  { %701 = vmatpush.msrb.mxu2 %v399_v39  ;;  %681 = vmatpush.msrb.mxu1 %v367_v41  ;;  %v469_v39 = vld [vmem:[#allocation8 + $0x398] sm:$0xff] }
  0xff   :  { %v501_v41 = vld [vmem:[#allocation8 + $0x498] sm:$0xff] }
 0x100   :  { %702 = vmatpush.msrb.mxu2 %v397_v42  ;;  %682 = vmatpush.msrb.mxu1 %v365_v43  ;;  %v527_v42 = vld [vmem:[#allocation8 + $0x568] sm:$0xff]  ;;  %v429_v43 = vld [vmem:[#allocation8 + $0x258] sm:$0xff] }
 0x102   :  { %703 = vmatpush.msrb.mxu2 %v395_v44  ;;  %683 = vmatpush.msrb.mxu1 %v363_v49  ;;  %v467_v44 = vld [vmem:[#allocation8 + $0x388] sm:$0xff]  ;;  %v497_v49 = vld [vmem:[#allocation8 + $0x478] sm:$0xff] }
 0x104   :  { %704 = vmatpush.msrb.mxu2 %v393_v45  ;;  %684 = vmatpush.msrb.mxu1 %v361_v53  ;;  %v499_v45 = vld [vmem:[#allocation8 + $0x488] sm:$0xff] }
 0x105   :  { %v495_v53 = vld [vmem:[#allocation8 + $0x468] sm:$0xff] }
 0x106   :  { %705 = vmatpush.msrb.mxu2 %v391_v46  ;;  %685 = vmatpush.msrb.mxu1 %v359_v56  ;;  %v525_v46 = vld [vmem:[#allocation8 + $0x558] sm:$0xff] }
 0x107   :  { %v461_v56 = vld [vmem:[#allocation8 + $0x358] sm:$0xff] }
 0x108   :  { %706 = vmatpush.msrb.mxu2 %v389_v50  ;;  %686 = vmatpush.msrb.mxu1 %v357_v58  ;;  %v523_v50 = vld [vmem:[#allocation8 + $0x548] sm:$0xff] }
 0x109   :  { %v519_v58 = vld [vmem:[#allocation8 + $0x528] sm:$0xff] }
 0x10a   :  { %707 = vmatpush.msrb.mxu2 %v387_v54  ;;  %687 = vmatpush.msrb.mxu1 %v355_v60  ;;  %v521_v54 = vld [vmem:[#allocation8 + $0x538] sm:$0xff]  ;;  %v459_v60 = vld [vmem:[#allocation8 + $0x348] sm:$0xff] }
 0x146   :  { %v245_v61 = vpop.f32.mrf.mxu1 }
 0x147   :  { %v1023_v62 = vmul.f32 %v245_v61, %v245_v61  ;;  %v305_v63 = vpop.f32.mrf.mxu0  ;;  %v491_v61 = vld [vmem:[#allocation8 + $0x448] sm:$0xff] }
 0x148   :  { %v1025_v1 = vmul.f32 %v305_v63, %v305_v63  ;;  %v419_v63 = vld [vmem:[#allocation8 + $0x208] sm:$0xff] }
 0x149   :  { %568 = vmatmul.f32.vlgmr.msrb.gmra.mxu3 %v1023_v62 }
 0x14a   :  { %628 = vmatmul.f32.vlgmr.msra.gmra.mxu2 %v1025_v1  ;;  %712 = vmatpush.msrb.mxu3 %v449_v0  ;;  %v457_v0 = vld [vmem:[#allocation8 + $0x338] sm:$0xff] }
 0x14b   :  { %772 = vmatpush.msra.mxu2 %v545_v2  ;;  %v489_v2 = vld [vmem:[#allocation8 + $0x438] sm:$0xff] }
 0x14c   :  { %713 = vmatpush.msrb.mxu3 %v447_v3  ;;  %v265_v6 = vpop.f32.mrf.mxu2  ;;  %v515_v3 = vld [vmem:[#allocation8 + $0x508] sm:$0xff] }
 0x14d   :  { %773 = vmatpush.msra.mxu2 %v543_v4  ;;  %v349_v8 = vmul.f32 %v265_v6, %v265_v6  ;;  %v285_v9 = vpop.f32.mrf.mxu3  ;;  %v455_v4 = vld [vmem:[#allocation8 + $0x328] sm:$0xff]  ;;  %v453_v6 = vld [vmem:[#allocation8 + $0x318] sm:$0xff] }
 0x14e   :  { %v1029_v11 = vmul.f32 %v285_v9, %v285_v9  ;;  %714 = vmatpush.msrb.mxu3 %v445_v5  ;;  %v325_v12 = vpop.f32.mrf.mxu1  ;;  %v487_v5 = vld [vmem:[#allocation8 + $0x428] sm:$0xff] }
 0x14f   :  { %774 = vmatpush.msra.mxu2 %v541_v7  ;;  %v1031_v15 = vmul.f32 %v325_v12, %v325_v12  ;;  %588 = vmatmul.f32.vlgmr.msra.gmra.mxu0 %v349_v8  ;;  %v485_v7 = vld [vmem:[#allocation8 + $0x418] sm:$0xff]  ;;  %v483_v9 = vld [vmem:[#allocation8 + $0x408] sm:$0xff] }
 0x150   :  { %608 = vmatmul.f32.vlgmr.msra.gmra.mxu1 %v1029_v11  ;;  %715 = vmatpush.msrb.mxu3 %v443_v10  ;;  %v546_v10 = vld [vmem:[%s1053_s4] sm:$0x3]  ;;  %s975_s4 = smov [#allocation10]  }
 0x151   :  { %732 = vmatpush.msra.mxu0 %v481_v13  ;;  %752 = vmatpush.msra.mxu1 %v513_v14  ;;  %v548_v13 = vperm.slane %v546_v10, 0  ;;  %s810_s17 = sshll.u32 %s975_s4, 4  ;;  %s811_s17 = int_to_ptr.vmem [resolvable:$true] %s810_s17 }
 0x152   :  { %775 = vmatpush.msra.mxu2 %v539_v16  ;;  %648 = vmatmul.f32.vlgmr.msra.gmra.mxu3 %v1031_v15 }
 0x153   :  { %708 = vmatmul.f32.vlgmr.msrb.gmra.mxu2 %v349_v8  ;;  %716 = vmatpush.msrb.mxu3 %v441_v17  ;;  %v451_v8 = vld [vmem:[#allocation8 + $0x308] sm:$0xff] }
 0x154   :  { %733 = vmatpush.msra.mxu0 %v479_v18  ;;  %753 = vmatpush.msra.mxu1 %v511_v19  ;;  %v345_v25 = vpop.f32.mrf.mxu2  ;;  %v549_v19 = vperm.slane %v546_v10, 1 }
 0x155   :  { %776 = vmatpush.msra.mxu2 %v537_v20  ;;  %717 = vmatpush.msrb.mxu3 %v439_v21  ;;  %v1035_v27 = vmul.f32 %v345_v25, %v345_v25 }
 0x156   :  { %734 = vmatpush.msra.mxu0 %v477_v22  ;;  %754 = vmatpush.msra.mxu1 %v509_v23 }
 0x157   :  { %777 = vmatpush.msra.mxu2 %v535_v24  ;;  %718 = vmatpush.msrb.mxu3 %v437_v26 }
 0x158   :  { %735 = vmatpush.msra.mxu0 %v475_v28  ;;  %755 = vmatpush.msra.mxu1 %v507_v29 }
 0x159   :  { %778 = vmatpush.msra.mxu2 %v533_v40  ;;  %668 = vmatmul.f32.vlgmr.msrb.gmra.mxu0 %v1035_v27 }
 0x15a   :  { %688 = vmatmul.f32.vlgmr.msrb.gmra.mxu1 %v1023_v62  ;;  %719 = vmatpush.msrb.mxu3 %v435_v30  ;;  %v517_v62 = vld [vmem:[#allocation8 + $0x518] sm:$0xff] }
 0x15b   :  { %736 = vmatpush.msra.mxu0 %v473_v31  ;;  %756 = vmatpush.msra.mxu1 %v505_v32 }
 0x15c   :  { %779 = vmatpush.msra.mxu2 %v531_v33  ;;  %720 = vmatpush.msrb.mxu3 %v433_v34 }
 0x15d   :  { %737 = vmatpush.msra.mxu0 %v471_v35  ;;  %757 = vmatpush.msra.mxu1 %v503_v36  ;;  %v800_v35 = vlaneseq }
 0x15e   :  { %780 = vmatpush.msra.mxu2 %v529_v37  ;;  %721 = vmatpush.msrb.mxu3 %v431_v38 }
 0x15f   :  { %738 = vmatpush.msra.mxu0 %v469_v39  ;;  %758 = vmatpush.msra.mxu1 %v501_v41  ;;  %vm802_vm4 = vcmp.lt.s32.totalorder %v800_v35, 256 }
 0x160   :  { %781 = vmatpush.msra.mxu2 %v527_v42  ;;  %722 = vmatpush.msrb.mxu3 %v429_v43 }
 0x161   :  { %739 = vmatpush.msra.mxu0 %v467_v44  ;;  %759 = vmatpush.msra.mxu1 %v499_v45 }
 0x162   :  { %782 = vmatpush.msra.mxu2 %v525_v46  ;;  %723 = vmatpush.msrb.mxu3 %v427_v47 }
 0x163   :  { %740 = vmatpush.msra.mxu0 %v465_v48  ;;  %760 = vmatpush.msra.mxu1 %v497_v49 }
 0x164   :  { %783 = vmatpush.msra.mxu2 %v523_v50  ;;  %724 = vmatpush.msrb.mxu3 %v425_v51 }
 0x165   :  { %741 = vmatpush.msra.mxu0 %v463_v52  ;;  %761 = vmatpush.msra.mxu1 %v495_v53 }
 0x166   :  { %784 = vmatpush.msra.mxu2 %v521_v54  ;;  %725 = vmatpush.msrb.mxu3 %v423_v55 }
 0x167   :  { %742 = vmatpush.msra.mxu0 %v461_v56  ;;  %762 = vmatpush.msra.mxu1 %v493_v57 }
 0x168   :  { %785 = vmatpush.msra.mxu2 %v519_v58  ;;  %726 = vmatpush.msrb.mxu3 %v421_v59 }
 0x169   :  { %743 = vmatpush.msra.mxu0 %v459_v60  ;;  %763 = vmatpush.msra.mxu1 %v491_v61 }
 0x16a   :  { %786 = vmatpush.msra.mxu2 %v517_v62  ;;  %727 = vmatpush.msrb.mxu3 %v419_v63 }
 0x16b   :  { %744 = vmatpush.msra.mxu0 %v457_v0  ;;  %764 = vmatpush.msra.mxu1 %v489_v2 }
 0x16c   :  { %787 = vmatpush.msra.mxu2 %v515_v3  ;;  %728 = vmatmul.f32.vlgmr.msrb.gmra.mxu3 %v1029_v11 }
 0x16d   :  { %788 = vmatmul.f32.vlgmr.msra.gmra.mxu2 %v1035_v27  ;;  %745 = vmatpush.msra.mxu0 %v455_v4 }
 0x16e   :  { %765 = vmatpush.msra.mxu1 %v487_v5 }
 0x16f   :  { %746 = vmatpush.msra.mxu0 %v453_v6 }
 0x170   :  { %766 = vmatpush.msra.mxu1 %v485_v7 }
 0x171   :  { %747 = vmatpush.msra.mxu0 %v451_v8 }
 0x172   :  { %767 = vmatpush.msra.mxu1 %v483_v9  ;;  %748 = vmatmul.f32.vlgmr.msra.gmra.mxu0 %v1025_v1 }
 0x173   :  { %768 = vmatmul.f32.vlgmr.msra.gmra.mxu1 %v1031_v15 }
 0x1cc   :  { %v569_v11 = vpop.f32.mrf.mxu3  ;;  %v589_v14 = vpop.f32.mrf.mxu0 }
 0x1cd   :  { %v609_v12 = vpop.f32.mrf.mxu1  ;;  %v570_v16 = vadd.f32 %v569_v11, %v548_v13  ;;  %v629_v17 = vpop.f32.mrf.mxu2 }
 0x1cf   :  { %v590_v18 = vadd.f32 %v589_v14, %v570_v16 }
 0x1d1   :  { %v610_v23 = vadd.f32 %v609_v12, %v590_v18 }
 0x1d3   :  { %v630_v25 = vadd.f32 %v629_v17, %v610_v23 }
 0x1d5   :  { %v649_v20 = vpop.f32.mrf.mxu3 }
 0x1d6   :  { %v669_v22 = vpop.f32.mrf.mxu0  ;;  %v709_v1 = vpop.f32.mrf.mxu2  ;;  %v650_v29 = vadd.f32 %v649_v20, %v630_v25 }
 0x1d7   :  { %v689_v21 = vpop.f32.mrf.mxu1 }
 0x1d8   :  { %v690_v24 = vadd.f32 %v689_v21, %v549_v19  ;;  %v670_v33 = vadd.f32 %v669_v22, %v650_v29 }
 0x1da   :  { %v710_v15 = vadd.f32 %v709_v1, %v690_v24  ;;  %v792_v37 = vmax.f32 %v670_v33, 0.0 }
 0x1ef   :  { %v729_v26 = vpop.f32.mrf.mxu3  ;;  %v749_v28 = vpop.f32.mrf.mxu0 }
 0x1f0   :  { %v730_v27 = vadd.f32 %v729_v26, %v710_v15  ;;  %v769_v30 = vpop.f32.mrf.mxu1  ;;  %v789_v32 = vpop.f32.mrf.mxu2 }
 0x1f2   :  { %v750_v40 = vadd.f32 %v749_v28, %v730_v27 }
 0x1f4   :  { %v770_v31 = vadd.f32 %v769_v30, %v750_v40 }
 0x1f6   :  { %v790_v34 = vadd.f32 %v789_v32, %v770_v31 }
 0x1f8   :  { %v793_v36 = vmax.f32 %v790_v34, 0.0 }
 0x1fa   :  { %v796_v38 = vrot.slane %v793_v36, 7 }
 0x1fc   :  { %v798_v39 = vsel %vm797_vm3, %v792_v37, %v796_v38 }
 0x1fd   :  { %804 = vst.msk [vmem:[#allocation10] sm:$0x3] %vm802_vm4, %v798_v39 }
 0x1fe   :  { %815 = dma.vmem_to_hbm [thread:$0]  %s811_s17, 32, %s813_s20, [#allocation4]  }
 0x1ff   :  { %963 = dma.done.wait [#allocation4], 32  }
 0x200   :  { %964 = vsyncadd [#allocation4], 4294967264 }
 0x201   :  { %820 = vsyncpa [#allocation3], 1 }
 0x202   :  { %821 = vsyncpa [#allocation6], 1 }
 0x203   :  { %822 = vsyncpa [#allocation9], 1 }
 0x204   :  { %823 = vsyncpa [#allocation4], 1 }

</bundles_post_ra>
